<compile_context>
chip_gen: v5e
topology: v5e:2x2
jax: 0.10.0
libtpu: 0.0.40
codegen_flags: <defaults>
</compile_context>

<pallas_src>
import jax
import jax.numpy as jnp
from jax.experimental import pallas as pl
from jax.experimental.pallas import tpu as pltpu


def _solu_kernel(x_ref, o_ref):
    # x_ref / o_ref: (block_rows, hidden) VMEM tiles; reduction along lanes.
    x = x_ref[...].astype(jnp.float32)
    m = jnp.max(x, axis=-1, keepdims=True)          # numerically stable softmax
    e = jnp.exp(x - m)
    s = jnp.sum(e, axis=-1, keepdims=True)
    inv_s = pl.reciprocal(s, approx=True)            # EUP slot, effectively free
    # Single fused expression: no separate full-tile `softmax` temp.
    o_ref[...] = (x * e * inv_s).astype(o_ref.dtype)


def _round_up(a: int, b: int) -> int:
    return ((a + b - 1) // b) * b


def _pick_block_rows(rows: int, hidden: int, itemsize: int,
                     target_tile_bytes: int = 2 << 20) -> int:
    """Largest 8-aligned row block such that one input tile ~= target bytes."""
    row_bytes = max(1, hidden * itemsize)
    br = max(8, (target_tile_bytes // row_bytes) // 8 * 8)
    rows8 = _round_up(rows, 8)
    br = min(br, rows8)
    # Prefer >= 2 grid steps so the "parallel" axis can shard across v7x's two
    # TensorCores (no effect on large inputs where br << rows anyway).
    if rows8 >= 16:
        br = min(br, max(8, _round_up(rows8 // 2, 8)))
    return int(br)


def solu(x: jax.Array, *, block_rows: int | None = None) -> jax.Array:
    """SoLU(x) = x * softmax(x, axis=-1), computed in a Pallas TPU kernel."""
    orig_shape = x.shape
    hidden = orig_shape[-1]
    x2 = x.reshape(-1, hidden)
    rows = x2.shape[0]
    itemsize = x2.dtype.itemsize

    if block_rows is None:
        block_rows = _pick_block_rows(rows, hidden, itemsize)

    # Ragged last block handled by Pallas masking -> no pad/slice HBM traffic.
    grid = (pl.cdiv(rows, block_rows),)

    # VMEM budget: double-buffered in + out tiles plus ~3 f32 intermediates,
    # with headroom; clamped well under v7x's 64 MiB physical VMEM.
    tile_in = block_rows * hidden * itemsize
    tile_f32 = block_rows * hidden * 4
    vmem_limit = 2 * 2 * tile_in + 3 * tile_f32 + (4 << 20)
    vmem_limit = int(min(max(vmem_limit, 16 << 20), 48 << 20))

    numel = rows * hidden
    cost = pl.CostEstimate(
        flops=4 * numel,            # sub, mul x2, add-reduce (order of magnitude)
        transcendentals=numel,      # one exp per element
        bytes_accessed=2 * numel * itemsize,
    )

    out = pl.pallas_call(
        _solu_kernel,
        out_shape=jax.ShapeDtypeStruct((rows, hidden), x.dtype),
        grid_spec=pltpu.PrefetchScalarGridSpec(
            num_scalar_prefetch=0,
            grid=grid,
            in_specs=[pl.BlockSpec((block_rows, hidden), lambda i: (i, 0))],
            out_specs=pl.BlockSpec((block_rows, hidden), lambda i: (i, 0)),
        ),
        compiler_params=pltpu.CompilerParams(
            dimension_semantics=("parallel",),
            vmem_limit_bytes=vmem_limit,
        ),
        cost_estimate=cost,
    )(x2)

    return out.reshape(orig_shape)


if __name__ == "__main__":
    key = jax.random.PRNGKey(0)

    # Small deterministic input consistent with the module: (batch=2, seq=8, hidden=32)
    x = jax.random.normal(key, (2, 8, 32), dtype=jnp.float32)
    y = solu(x)
    jax.block_until_ready(y)
    y_ref = x * jax.nn.softmax(x, axis=-1)
    assert y.shape == x.shape and y.dtype == x.dtype
    # approx reciprocal -> ~1e-3 relative error budget.
    assert jnp.allclose(y, y_ref, atol=2e-3, rtol=2e-3)

    # Second check: ragged row count (15 rows -> block_rows=8, masked last block).
    x2 = jax.random.normal(jax.random.PRNGKey(1), (3, 5, 32), dtype=jnp.float32)
    y2 = solu(x2)
    jax.block_until_ready(y2)
    y2_ref = x2 * jax.nn.softmax(x2, axis=-1)
    assert y2.shape == x2.shape and y2.dtype == x2.dtype
    assert jnp.allclose(y2, y2_ref, atol=2e-3, rtol=2e-3)

    print("KERNEL_OK")
</pallas_src>

<mosaic_0001>
module attributes {stable_mosaic.version = 11 : i64} {
  func.func @_solu_kernel(%arg0: i32, %arg1: memref<8x32xf32, #tpu.memory_space<vmem>>, %arg2: memref<8x32xf32, #tpu.memory_space<vmem>>) attributes {dimension_semantics = [#tpu.dimension_semantics<parallel>], iteration_bounds = array<i64: 2>, scalar_prefetch = 0 : i64, scratch_operands = 0 : i64, tpu.core_type = #tpu.core_type<tc>, window_params = [{transform_indices = @transform_0, window_bounds = array<i64: 8, 32>}, {transform_indices = @transform_1, window_bounds = array<i64: 8, 32>}]} {
    %c0 = arith.constant 0 : index
    %c0_0 = arith.constant 0 : index
    %0 = vector.load %arg1[%c0, %c0_0] : memref<8x32xf32, #tpu.memory_space<vmem>>, vector<8x32xf32>
    %cst = arith.constant dense<0xFF800000> : vector<8xf32>
    %1 = vector.multi_reduction <maximumf>, %0, %cst [1] : vector<8x32xf32> to vector<8xf32>
    %2 = vector.shape_cast %1 : vector<8xf32> to vector<8x1xf32>
    %3 = vector.broadcast %2 : vector<8x1xf32> to vector<8x32xf32>
    %4 = arith.subf %0, %3 : vector<8x32xf32>
    %5 = math.exp %4 : vector<8x32xf32>
    %cst_1 = arith.constant dense<0.000000e+00> : vector<8xf32>
    %6 = vector.multi_reduction <add>, %5, %cst_1 [1] : vector<8x32xf32> to vector<8xf32>
    %7 = vector.shape_cast %6 : vector<8xf32> to vector<8x1xf32>
    %8 = tpu.reciprocal %7 {approx = true} : vector<8x1xf32> -> vector<8x1xf32>
    %9 = arith.mulf %0, %5 : vector<8x32xf32>
    %10 = vector.broadcast %8 : vector<8x1xf32> to vector<8x32xf32>
    %11 = arith.mulf %9, %10 : vector<8x32xf32>
    %c0_2 = arith.constant 0 : index
    %c0_3 = arith.constant 0 : index
    %12 = vector.load %arg2[%c0_2, %c0_3] : memref<8x32xf32, #tpu.memory_space<vmem>>, vector<8x32xf32>
    tpu.vector_store %arg2[%c0_2, %c0_3], %11 {strides = array<i32>} : memref<8x32xf32, #tpu.memory_space<vmem>>, vector<8x32xf32>,
    return
  }
  func.func @transform_0(%arg0: i32) -> (i32, i32) {
    %c0_i32 = arith.constant 0 : i32
    %c0_i32_0 = arith.constant 0 : i32
    return %arg0, %c0_i32 : i32, i32
  }
  func.func @transform_1(%arg0: i32) -> (i32, i32) {
    %c0_i32 = arith.constant 0 : i32
    %c0_i32_0 = arith.constant 0 : i32
    return %arg0, %c0_i32 : i32, i32
  }
}

</mosaic_0001>

<bundles_post_ra>
// kernel: tpu_custom_call.1
= control target key start
LH: loop header
LB: loop body
LE: loop exit
PB: predicated region body
PF: predicated region fallthrough
CT: control target
= control target key end

     0   :  { %6 = vsyncpa [#allocation3], 0  ;;  %s535_s0 = inlined_call_operand.hbm [shape: f32[16,32], index: 0, kind: input, shape index: {}]   ;;  %s536_s1 = inlined_call_operand.hbm [shape: f32[16,32], index: 1, kind: output, shape index: {}]  }
   0x1   :  { %8 = vsyncpa [#allocation3 + $0x1], 0 }
   0x2   :  { %9 = vsyncpa [#allocation4], 0 }
   0x3   :  { %11 = vsyncpa [#allocation4 + $0x1], 0  ;;  %s405_s6 = smov 0   ;;  %s407_s7 = smov 0  }
   0x4   :  { %s409_s8 = smov 0   ;;  %s411_s9 = smov 0  }
   0x5 LB: > { %s426_s10 = sadd.s32 4294967295, %s393_s9   ;;  %s235_s11 = sadd.s32 4294967294, %s393_s9   ;;  %s393_s9 = sphi %s411_s9, %s546_s9   ;;  %s389_s8 = sphi %s409_s8, %s545_s8   ;;  %s385_s7 = sphi %s407_s7, %s544_s7   ;;  %s381_s6 = sphi %s405_s6, %s543_s6  }
   0x6   : > { %s430_s12 = sadd.s32 1, %s393_s9   ;;  %s24_s13 = sadd.s32 1, %s389_s8 }
   0x7   : > { %s21_s14 = ssub.s32 %s393_s9, %s430_s12  ;;  %p31_p0 = scmp.ne.s32.totalorder %s389_s8, %s385_s7 }
   0x8   : > { %p22_p1 = scmp.eq.s32.totalorder %s21_s14, 0  ;;  %p32_p2 = scmp.eq.s32.totalorder %s393_s9, 0 }
   0x9   : > { %p37_p3 = scmp.ne.s32.totalorder %s385_s7, %s381_s6  ;;  %p38_p4 = scmp.eq.s32.totalorder %s426_s10, 0 }
   0xa   : > { %s442_s15 = scalar_select %p22_p1, %s389_s8, %s24_s13  }
   0xb   : > { %p444_p5 = por %p32_p2, %p31_p0  ;;  %p448_p6 = por %p38_p4, %p37_p3 }
   0xc   : > { %p61_p7 = scmp.eq.s32.totalorder %s426_s10, 1  ;;  %p67_p8 = scmp.eq.s32.totalorder %s235_s11, 1 }
   0xd   : > { %p259_p10 = scmp.lt.s32.totalorder %s393_s9, 2  ;;  %s87_s20 = sand.u32 1, %s389_s8  }
   0xe   : > { %p455_p11 = por %p61_p7, %p31_p0  ;;  %p459_p12 = por %p67_p8, %p37_p3 }
   0xf   : > { %s239_s21 = sshll.u32 %s393_s9, 3  ;;  %s238_s22 = sshll.u32 %s87_s20, 3 }
  0x10   : > { %s95_s25 = scalar_lea.hbm %s535_s0, %s239_s21  ;;  %s91_s27 = scalar_lea.vmem [#allocation2], %s238_s22 }
  0x11   : > { %s97_s26 = sshll.u32 %s95_s25, 4  ;;  %s99_s28 = sshll.u32 %s91_s27, 4  ;;  %s98_s26 = int_to_ptr.hbm [resolvable:$true] %s97_s26  ;;  %s100_s28 = int_to_ptr.vmem [resolvable:$true] %s99_s28 }
  0x12   : > { %p470_p13 = pnand %p259_p10, %p444_p5  ;;  %p240_p0 = scmp.ge.s32.totalorder %s393_s9, 1 }
  0x13   : > { %p104_p1 = scmp.lt.s32.totalorder %s393_s9, 3  ;;  %s88_s30 = scalar_lea.sflag [#allocation3], %s87_s20 }
  0x14   : > { %s297_s2 = sshra.s32 %s98_s26, 4  ;;  %p301_p3 = pneg %p470_p13  ;;  %s298_s2 = int_to_ptr.hbm [resolvable:$true] %s297_s2 }
  0x15   : > { %s299_s3 = scalar_lea.hbm %s298_s2, 8  ;;  %s304_s11 = scalar_lea.hbm %s535_s0, 16 }
  0x16   : > { %p300_p2 = scmp.ne.s32.totalorder %s298_s2, %s299_s3  ;;  %p305_p5 = scmp.lt.s32.totalorder %s298_s2, %s535_s0 }
  0x17   : > { %p306_p8 = scmp.lt.s32.totalorder %s304_s11, %s299_s3 }
  0x18   : > { %p302_p4 = pnand %p301_p3, %p300_p2 }
  0x19   : > { %p307_p10 = por %p306_p8, %p305_p5 }
  0x1a   : > { %p303_p7 = pneg %p302_p4 }
  0x1c   : > { %p308_p9 = pnand %p307_p10, %p303_p7 }
  0x1e   : > { %311 = shalt.err (!%p308_p9)
}
  0x1f   : > { %254 = dma.hbm_to_vmem [thread:$0]  (!%p470_p13), %s98_s26, 128, %s100_s28, %s88_s30  }
  0x20   : > { %p105_p2 = pnand %p240_p0, %p104_p1 }
  0x21   : > { %s491_s16 = sand.u32 (!%p105_p2), 1, %s385_s7  }
  0x22   : > { %108 = sbr.rel (%p105_p2) target bundleno = 298 (0x12a), region = 24  ;;  %s241_s20 = sshll.u32 (!%p105_p2), %s491_s16, 3 }
  0x23   : > { %s111_s21 = scalar_lea.sflag (!%p105_p2), [#allocation3], %s491_s16  ;;  %s114_s22 = scalar_lea.vmem (!%p105_p2), [#allocation2], %s241_s20 }
  0x27   : > { %372 = dma.done.wait (%p448_p6), %s111_s21, 128  }
  0x28   : > { %374 = vsyncadd (%p448_p6), %s111_s21, 4294967168  ;;  %vm135_vm0 = vcmask 261120   ;;  %v134_v0 = vld [vmem:[%s114_s22] sm:$0xff]  ;;  %s244_s23 = sshll.u32 %s426_s10, 3  ;;  %s133_s26 = scalar_lea.vmem [#allocation5], %s241_s20 }
  0x29   : > { %v136_v1 = vsel %vm135_vm0, %v134_v0, -inf  ;;  %s160_s25 = scalar_lea.hbm %s536_s1, %s244_s23  ;;  %s162_s27 = sshll.u32 %s133_s26, 4  ;;  %s163_s27 = int_to_ptr.vmem [resolvable:$true] %s162_s27 }
  0x2a   : > { %137 = vmax.xlane.f32.xlu0 %v136_v1  ;;  %s164_s28 = sshll.u32 %s160_s25, 4  ;;  %s150_s29 = scalar_lea.sflag [#allocation4], %s491_s16  ;;  %s165_s28 = int_to_ptr.hbm [resolvable:$true] %s164_s28 }
  0x2b   : > { %s341_s30 = sshra.s32 %s165_s28, 4  ;;  %s347_s4 = scalar_lea.hbm %s536_s1, 16  ;;  %s342_s30 = int_to_ptr.hbm [resolvable:$true] %s341_s30 }
  0x2c   : > { %s343_s10 = scalar_lea.hbm %s342_s30, 8  ;;  %p348_p0 = scmp.lt.s32.totalorder %s342_s30, %s536_s1 }
  0x2d   : > { %p344_p6 = scmp.ne.s32.totalorder %s342_s30, %s343_s10  ;;  %p349_p1 = scmp.lt.s32.totalorder %s347_s4, %s343_s10 }
  0x2f   : > { %p345_p9 = pnand %p344_p6, %p455_p11  ;;  %p350_p3 = por %p349_p1, %p348_p0 }
  0x31   : > { %p346_p13 = pneg %p345_p9 }
  0x33   : > { %p351_p4 = pnand %p350_p3, %p346_p13 }
  0x9d   : > { %v138_v2 = vpop.xlane.xlu0 %137 }
  0x9e   : > { %v139_v3 = vsub.f32 %v134_v0, %v138_v2 }
  0xa0   : > { %v140_v4 = vmul.f32 1.442695, %v139_v3 }
  0xa2   : > { %293 = vpow2.f32 %v140_v4 }
  0xa8   : > { %v294_v5 = vpop.eup %293 }
  0xa9   : > { %v142_v6 = vsel %vm135_vm0, %v294_v5, 0.0  ;;  %v146_v8 = vmul.f32 %v294_v5, %v134_v0 }
  0xaa   : > { %143 = vadd.xlane.f32.xlu0 %v142_v6 }
 0x11d   : > { %v144_v7 = vpop.xlane.xlu0 %143 }
 0x11e   : > { %295 = vrcp.f32 %v144_v7 }
 0x124   : > { %v296_v9 = vpop.eup %295 }
 0x125   : > { %v147_v10 = vmul.f32 %v296_v9, %v146_v8 }
 0x127   : > { %148 = vst.msk [vmem:[%s133_s26] sm:$0xff] %vm135_vm0, %v147_v10 }
 0x128   : > { %354 = shalt.err (!%p351_p4)
}
 0x129   : > { %249 = dma.vmem_to_hbm [thread:$0]  (%p455_p11), %s163_s27, 128, %s165_s28, %s150_s29  }
 0x12a PF: > { %s176_s13 = sand.u32 1, %s381_s6   ;;  %p542_p7 = scmp.ge.s32.totalorder %s393_s9, 2 }
 0x12b   : > { %s177_s14 = scalar_lea.sflag [#allocation4], %s176_s13 }
 0x12c   : > { %p256_p5 = pnand %p542_p7, %p459_p12 }
 0x12e   : > { %p257_p8 = pneg %p256_p5 }
 0x130   : > { %376 = dma.done.wait (%p257_p8), %s177_s14, 128  }
 0x131   : > { %378 = vsyncadd (%p257_p8), %s177_s14, 4294967168  ;;  %p14_p10 = scmp.ge.s32.totalorder %s430_s12, 4   ;;  %s543_s6 = smov %s385_s7 }
 0x132   : > { %s544_s7 = smov %s389_s8  ;;  %s545_s8 = smov %s442_s15 }
 0x133   : > { %s546_s9 = smov %s430_s12  ;;  %16 = sbr.rel (!%p14_p10) target bundleno = 5 (0x5), region = 69 }
 0x138   :  { %183 = vsyncpa [#allocation3], 1 }
 0x139   :  { %185 = vsyncpa [#allocation3 + $0x1], 1 }
 0x13a   :  { %186 = vsyncpa [#allocation4], 1 }
 0x13b   :  { %188 = vsyncpa [#allocation4 + $0x1], 1 }

</bundles_post_ra>
